<compile_context>
chip_gen: v7x
topology: tpu7x:2x2x1
jax: 0.10.0
libtpu: 0.0.40
codegen_flags: <defaults>
</compile_context>

<pallas_src>
import jax
import jax.numpy as jnp
from jax.experimental import pallas as pl
from jax.experimental.pallas import tpu as pltpu

DEFAULT_SAMPLE_RATE = 16000
DEFAULT_BUFFER_SIZE = 256

_LANE = 128
_MAX_BLOCK_BYTES = 3 * 1024 * 1024   # per-block; x4 (in+out, double-buffered) = 12 MiB
_MAX_ROWS = 1024                     # diminishing returns beyond 512-1024 rows


def _round_up(x: int, m: int) -> int:
    return ((x + m - 1) // m) * m


def _choose_tiles(B: int, L: int, itemsize: int):
    """Pick (row_tile, col_tile) under the VMEM budget."""
    # Column tile: full L if an 8-row block fits; otherwise the largest
    # multiple of 128 that keeps an 8-row block inside the budget (large
    # buffer_size / v7x 64 MiB VMEM case).
    if 8 * L * itemsize <= _MAX_BLOCK_BYTES:
        col_tile = L
    else:
        col_tile = max(_LANE, (_MAX_BLOCK_BYTES // (8 * itemsize)) // _LANE * _LANE)

    # Row tile: biggest multiple of 8 within budget, capped and clamped to the
    # (8-rounded) batch.  For B < 8 use the full batch dim (explicitly legal).
    rows_budget = max(8, (_MAX_BLOCK_BYTES // (col_tile * itemsize)) // 8 * 8)
    if B < 8:
        rows = B
    else:
        rows = min(_MAX_ROWS, rows_budget, _round_up(B, 8))
        # Keep >= 2 grid steps once the batch is big enough so v7x's two
        # TensorCores both get work (no-op on single-core v5e/v6e).
        n_steps = -(-B // rows) * -(-L // col_tile)
        if B >= 16 and n_steps < 2:
            rows = max(8, _round_up((B + 1) // 2, 8))
    return rows, col_tile


def _make_fix_length_kernel(n_true: int, L: int, col_tile: int):
    """Kernel factory.  n_true = true signal length (static Python int).

    - n_true <  L (pad): columns >= n_true of the (partial / clamped) input
      block hold unspecified or stale data -> zero them with a mask keyed on
      the absolute output column index.
    - n_true >= L (truncate): every loaded column is valid -> pure copy,
      no mask emitted at all.
    Either way the store is a full-width, unmasked, lane-dense store.
    """
    def kernel(x_ref, o_ref):
        x = x_ref[...]
        if n_true < L:  # static branch, resolved at trace time
            col0 = pl.program_id(1) * col_tile
            t = jax.lax.broadcasted_iota(jnp.int32, x.shape, x.ndim - 1) + col0
            x = jnp.where(t < n_true, x, jnp.zeros_like(x))
        o_ref[...] = x
    return kernel


def fix_length(signal: jax.Array, buffer_size: int) -> jax.Array:
    """util.fix_length: zero-pad / truncate the last axis to buffer_size."""
    squeeze = signal.ndim == 1
    x = signal[None, :] if squeeze else signal
    assert x.ndim == 2, "signal must be (time,) or (batch, time)"
    B, n = x.shape
    assert n >= 1
    L = _round_up(buffer_size, _LANE)          # lane-padded output width
    itemsize = jnp.dtype(x.dtype).itemsize

    rows, col_tile = _choose_tiles(B, L, itemsize)
    grid_rows = -(-B // rows)
    grid_cols = -(-L // col_tile)

    need_mask = n < L
    if need_mask and grid_cols > 1:
        # Column blocks whose start lies beyond the signal clamp to the last
        # in-bounds input block; the absolute-column mask zeroes them fully.
        last_in_col_block = max(0, (n - 1) // col_tile)
        in_index_map = lambda i, j: (i, jnp.minimum(j, last_in_col_block))
    else:
        in_index_map = lambda i, j: (i, j)

    kernel = _make_fix_length_kernel(n, L, col_tile)

    out = pl.pallas_call(
        kernel,
        out_shape=jax.ShapeDtypeStruct((B, L), x.dtype),
        grid=(grid_rows, grid_cols),
        in_specs=[pl.BlockSpec((rows, col_tile), in_index_map)],
        out_specs=pl.BlockSpec((rows, col_tile), lambda i, j: (i, j)),
        compiler_params=pltpu.CompilerParams(
            dimension_semantics=("parallel", "parallel")),
    )(x)

    if L != buffer_size:   # layout glue only; no-op when buffer_size % 128 == 0
        out = out[:, :buffer_size]
    return out[0] if squeeze else out


class SynthModule0D:
    """JAX/Pallas port of torchsynth SynthModule0Ddeprecated."""

    def __init__(self, sample_rate: int = DEFAULT_SAMPLE_RATE,
                 buffer_size: int = DEFAULT_BUFFER_SIZE):
        # __init__ only sets parameters (no compute), mirroring the torch module.
        self.sample_rate = jnp.int32(sample_rate)
        self.buffer_size = int(buffer_size)
        self.batch_size = 1
        self.torchparameters = {}   # ParameterDict equivalent (empty in base class)

    def seconds_to_samples(self, seconds):
        return jnp.round(seconds * self.sample_rate).astype(jnp.int32)

    def to_buffer_size(self, signal):
        return fix_length(signal, self.buffer_size)

    def _forward(self, signal):
        # TODO(synk): base class _forward raises NotImplementedError; the
        # provided signal stands in for a derived module's _forward output.
        return signal

    def forward(self, signal):
        return self.to_buffer_size(self._forward(signal))


if __name__ == "__main__":
    key = jax.random.PRNGKey(0)
    k1, k2, k3, k4, k5 = jax.random.split(key, 5)
    mod = SynthModule0D(sample_rate=16000, buffer_size=DEFAULT_BUFFER_SIZE)

    # 1) unbatched, shorter than buffer_size -> zero pad
    sig_short = jax.random.normal(k1, (200,), dtype=jnp.float32)
    out_short = jax.block_until_ready(mod.forward(sig_short))
    assert out_short.shape == (DEFAULT_BUFFER_SIZE,)
    assert jnp.allclose(out_short[:200], sig_short)
    assert jnp.all(out_short[200:] == 0.0)

    # 2) unbatched, longer than buffer_size -> truncate
    sig_long = jax.random.normal(k2, (300,), dtype=jnp.float32)
    out_long = jax.block_until_ready(mod.forward(sig_long))
    assert out_long.shape == (DEFAULT_BUFFER_SIZE,)
    assert jnp.allclose(out_long, sig_long[:DEFAULT_BUFFER_SIZE])

    # 3) batched pad, B=16 -> 2-step "parallel" grid (v7x megacore split)
    batch_pad = jax.random.normal(k3, (16, 200), dtype=jnp.float32)
    out_bp = jax.block_until_ready(mod.forward(batch_pad))
    assert out_bp.shape == (16, DEFAULT_BUFFER_SIZE)
    assert jnp.allclose(out_bp[:, :200], batch_pad)
    assert jnp.all(out_bp[:, 200:] == 0.0)

    # 4) batched truncate with a batch that is NOT a multiple of 8 (cdiv grid,
    #    partial row block)
    batch_trunc = jax.random.normal(k4, (13, 384), dtype=jnp.float32)
    out_bt = jax.block_until_ready(mod.forward(batch_trunc))
    assert out_bt.shape == (13, DEFAULT_BUFFER_SIZE)
    assert jnp.allclose(out_bt, batch_trunc[:, :DEFAULT_BUFFER_SIZE])

    # 5) larger batch pad, B=48 -> row tile halved to keep >=2 grid steps
    batch_big = jax.random.normal(k5, (48, 200), dtype=jnp.float32)
    out_bb = jax.block_until_ready(mod.forward(batch_big))
    assert out_bb.shape == (48, DEFAULT_BUFFER_SIZE)
    assert jnp.allclose(out_bb[:, :200], batch_big)
    assert jnp.all(out_bb[:, 200:] == 0.0)

    # seconds_to_samples sanity check
    assert int(mod.seconds_to_samples(jnp.float32(0.01))) == 160

    print("KERNEL_OK")
</pallas_src>

<mosaic_0001>
module attributes {stable_mosaic.version = 11 : i64} {
  func.func @kernel(%arg0: i32, %arg1: i32, %arg2: memref<1x256xf32, #tpu.memory_space<vmem>>, %arg3: memref<1x256xf32, #tpu.memory_space<vmem>>) attributes {dimension_semantics = [#tpu.dimension_semantics<parallel>, #tpu.dimension_semantics<parallel>], iteration_bounds = array<i64: 1, 1>, scalar_prefetch = 0 : i64, scratch_operands = 0 : i64, tpu.core_type = #tpu.core_type<tc>, window_params = [{transform_indices = @transform_0, window_bounds = array<i64: 1, 256>}, {transform_indices = @transform_1, window_bounds = array<i64: 1, 256>}]} {
    %c0 = arith.constant 0 : index
    %c0_0 = arith.constant 0 : index
    %0 = vector.load %arg2[%c0, %c0_0] : memref<1x256xf32, #tpu.memory_space<vmem>>, vector<1x256xf32>
    %c256_i32 = arith.constant 256 : i32
    %1 = arith.muli %arg1, %c256_i32 : i32
    %2 = tpu.iota {dimensions = array<i32: 1>} : vector<1x256xi32>
    %3 = vector.broadcast %1 : i32 to vector<1x256xi32>
    %4 = arith.addi %2, %3 : vector<1x256xi32>
    %c200_i32 = arith.constant 200 : i32
    %5 = vector.broadcast %c200_i32 : i32 to vector<1x256xi32>
    %6 = arith.cmpi slt, %4, %5 : vector<1x256xi32>
    %cst = arith.constant 0.000000e+00 : f32
    %7 = vector.broadcast %cst : f32 to vector<1x256xf32>
    %8 = arith.select %6, %0, %7 : vector<1x256xi1>, vector<1x256xf32>
    %c0_1 = arith.constant 0 : index
    %c0_2 = arith.constant 0 : index
    %9 = vector.load %arg3[%c0_1, %c0_2] : memref<1x256xf32, #tpu.memory_space<vmem>>, vector<1x256xf32>
    tpu.vector_store %arg3[%c0_1, %c0_2], %8 {strides = array<i32>} : memref<1x256xf32, #tpu.memory_space<vmem>>, vector<1x256xf32>,
    return
  }
  func.func @transform_0(%arg0: i32, %arg1: i32) -> (i32, i32) {
    %c0_i32 = arith.constant 0 : i32
    return %arg0, %arg1 : i32, i32
  }
  func.func @transform_1(%arg0: i32, %arg1: i32) -> (i32, i32) {
    %c0_i32 = arith.constant 0 : i32
    return %arg0, %arg1 : i32, i32
  }
}

</mosaic_0001>

<bundles_post_ra>
// kernel: tpu_custom_call.1
= control target key start
LH: loop header
LB: loop body
LE: loop exit
PB: predicated region body
PF: predicated region fallthrough
CT: control target
= control target key end

     0   :  { %6 = vsyncpa [#allocation3], 0  ;;  %s170_s0 = inlined_call_operand.hbm [shape: f32[1,200], index: 0, kind: input, shape index: {}]   ;;  %s171_s1 = inlined_call_operand.hbm [shape: f32[1,256], index: 1, kind: output, shape index: {}]  }
   0x1   :  { %7 = vsyncpa [#allocation4], 0  ;;  %s133_s6 = smov [#allocation2]   ;;  %s85_s10 = scalar_lea.hbm %s170_s0, 32 }
   0x2   :  { %s14_s7 = sshll.u32 %s133_s6, 4  ;;  %p86_p0 = scmp.ne.s32.totalorder %s170_s0, %s85_s10  ;;  %s15_s7 = int_to_ptr.vmem [resolvable:$true] %s14_s7 }
   0x3   :  { %p89_p1 = scmp.lt.u32.totalorder %s85_s10, %s170_s0 }
   0x5   :  { %p91_p2 = pnand %p89_p1, %p86_p0 }
   0x7   :  { %94 = shalt.err (!%p91_p2)
}
   0x8   :  { %s95_s15 = scalar_lea.vmem %s15_s7, 32  ;;  %p100_p4 = scmp.lt.s32.totalorder %s15_s7, %s15_s7 }
   0x9   :  { %p96_p3 = scmp.ne.s32.totalorder %s15_s7, %s95_s15  ;;  %p101_p5 = scmp.lt.s32.totalorder %s95_s15, %s95_s15 }
   0xb   :  { %p102_p6 = por %p101_p5, %p100_p4 }
   0xd   :  { %p103_p7 = pnand %p102_p6, %p96_p3 }
   0xf   :  { %106 = shalt.err (!%p103_p7)
}
  0x10   :  { %17 = dma.hbm_to_vmem [thread:$0]  %s170_s0, 32, %s15_s7, [#allocation3]  }
  0x11   :  { %129 = dma.done.wait [#allocation3], 32  }
  0x12   :  { %130 = vsyncadd [#allocation3], 4294967264  ;;  %v23_v0 = vlaneseq  ;;  %v134_v1 = vmov 1966171168   ;;  %v21_v9 = vld [vmem:[#allocation2] sm:$0x3] }
  0x13   :  { %v48_v2 = vunpack.c.l.s4 %v134_v1  ;;  %s135_s18 = smov [#allocation5]  }
  0x14   :  { %v24_v3 = vand.u32 127, %v23_v0  ;;  %v33_v4 = vshrl.u32 %v23_v0, 7  ;;  %s73_s0 = sshll.u32 %s135_s18, 4  ;;  %vm64_vm1 = vcmp.lt.s32.totalorder %v23_v0, 256  ;;  %s74_s0 = int_to_ptr.vmem [resolvable:$true] %s73_s0 }
  0x15   :  { %v49_v8 = vunpack.c.0.s8 %v48_v2  ;;  %s107_s19 = scalar_lea.vmem %s74_s0, 32  ;;  %p112_p9 = scmp.lt.s32.totalorder %s74_s0, %s74_s0 }
  0x16   :  { %v25_v5 = vadd.s32 128, %v24_v3  ;;  %v34_v6 = vsub.s32 0, %v33_v4  ;;  %v38_v7 = vsub.s32 1, %v33_v4  ;;  %p108_p8 = scmp.ne.s32.totalorder %s74_s0, %s107_s19  ;;  %p113_p10 = scmp.lt.s32.totalorder %s107_s19, %s107_s19 }
  0x17   :  { %v52_v12 = vsub.s32 %v49_v8, %v33_v4 }
  0x18   :  { %vm30_vm0 = vcmp.lt.s32.totalorder %v25_v5, 200  ;;  %v35_v10 = vrot.slane %v21_v9, %v34_v6  ;;  %v39_v11 = vrot.slane %v21_v9, %v38_v7  ;;  %p114_p11 = por %p113_p10, %p112_p9 }
  0x1a   :  { %v43_v13 = vsel %vm30_vm0, %v39_v11, 0.0  ;;  %p115_p12 = pnand %p114_p11, %p108_p8 }
  0x1b   :  { %v46_v14 = vcombine.low %v35_v10, %v43_v13 }
  0x1d   :  { %v53_v15 = vrot.slane %v46_v14, %v52_v12 }
  0x1f   :  { %v60_v16 = vrot.slane %v53_v15, %v52_v12 }
  0x21   :  { %66 = vst.msk [vmem:[#allocation5] sm:$0x3] %vm64_vm1, %v60_v16 }
  0x22   :  { %118 = shalt.err (!%p115_p12)
}
  0x23   :  { %s119_s22 = scalar_lea.hbm %s171_s1, 32 }
  0x24   :  { %p120_p13 = scmp.ne.s32.totalorder %s171_s1, %s119_s22  ;;  %p123_p0 = scmp.lt.u32.totalorder %s119_s22, %s171_s1 }
  0x26   :  { %p125_p1 = pnand %p123_p0, %p120_p13 }
  0x28   :  { %128 = shalt.err (!%p125_p1)
}
  0x29   :  { %76 = dma.vmem_to_hbm [thread:$0]  %s74_s0, 32, %s171_s1, [#allocation4]  }
  0x2a   :  { %131 = dma.done.wait [#allocation4], 32  }
  0x2b   :  { %132 = vsyncadd [#allocation4], 4294967264 }
  0x2c   :  { %80 = vsyncpa [#allocation3], 1 }
  0x2d   :  { %81 = vsyncpa [#allocation4], 1 }

</bundles_post_ra>
